<compile_context>
chip_gen: v5e
topology: v5e:2x2
jax: 0.10.0
libtpu: 0.0.40
codegen_flags: <defaults>
</compile_context>

<pallas_src>
import functools

import jax
import jax.numpy as jnp
from jax.experimental import pallas as pl
from jax.experimental.pallas import tpu as pltpu

_LANES = 128
_TILE_ROWS = 512   # 512 sublane-rows x 128 lanes = 65536 edges per grid step
_ROW_ALIGN = 32    # int8 mask output -> native (32, 128) tile alignment


def _dropedge_kernel(bits_ref, edge_ref, out_ref, mask_ref, *, threshold):
    """bits_ref: (TR, 128) uint32; edge_ref: (2, TR, 128) int32."""
    # keep iff bits >= drop_prob * 2^32  <=>  uniform >= drop_prob
    keep = bits_ref[...] >= jnp.uint32(threshold)                  # (TR, 128) bool
    mask_ref[...] = keep.astype(jnp.int8)
    out_ref[...] = jnp.where(keep[None, :, :], edge_ref[...], jnp.int32(-1))


def drop_edge(edge_index, drop_prob, seed=0):
    """edge_index: (2, E) int32. Returns (compacted_edge_index, num_kept).

    compacted_edge_index[:, :num_kept] are the kept edges (original order);
    remaining columns are padded with -1.
    """
    assert edge_index.ndim == 2 and edge_index.shape[0] == 2
    E = int(edge_index.shape[1])
    edge_index = edge_index.astype(jnp.int32)

    # Integer keep-threshold (clamped so it fits uint32).
    threshold = min(int(round(float(drop_prob) * 2.0**32)), 2**32 - 1)

    # Dense layout: rows of 128 lanes, rows aligned to the int8 tile.
    rows = -(-E // _LANES)
    rows = max(_ROW_ALIGN, ((rows + _ROW_ALIGN - 1) // _ROW_ALIGN) * _ROW_ALIGN)
    tile_rows = min(_TILE_ROWS, rows)
    num_tiles = -(-rows // tile_rows)
    rows_p = num_tiles * tile_rows
    Ep = rows_p * _LANES

    edge_p = jnp.full((2, Ep), -1, dtype=jnp.int32).at[:, :E].set(edge_index)
    edge3 = edge_p.reshape(2, rows_p, _LANES)

    # Per-edge random uint32 bits (padding columns are sliced away afterwards).
    bits = jax.random.bits(jax.random.PRNGKey(seed), (rows_p, _LANES),
                           dtype=jnp.uint32)

    kernel = functools.partial(_dropedge_kernel, threshold=threshold)
    masked3, mask2 = pl.pallas_call(
        kernel,
        out_shape=(
            jax.ShapeDtypeStruct((2, rows_p, _LANES), jnp.int32),  # masked edges
            jax.ShapeDtypeStruct((rows_p, _LANES), jnp.int8),      # keep mask
        ),
        grid=(num_tiles,),
        in_specs=[
            pl.BlockSpec((tile_rows, _LANES), lambda i: (i, 0)),      # bits
            pl.BlockSpec((2, tile_rows, _LANES), lambda i: (0, i, 0)),  # edges
        ],
        out_specs=(
            pl.BlockSpec((2, tile_rows, _LANES), lambda i: (0, i, 0)),
            pl.BlockSpec((tile_rows, _LANES), lambda i: (i, 0)),
        ),
        compiler_params=pltpu.CompilerParams(
            dimension_semantics=("parallel",)),
    )(bits, edge3)

    masked = masked3.reshape(2, Ep)[:, :E]
    mask1d = mask2.reshape(Ep)[:E].astype(jnp.int32)

    num_kept = jnp.sum(mask1d)
    # O(E) stable compaction: prefix-sum positions + scatter.
    # Dropped columns are routed to index E (out of bounds) and discarded.
    dest = jnp.where(mask1d == 1, jnp.cumsum(mask1d) - 1, E)
    compacted = jnp.full((2, E), -1, dtype=jnp.int32)
    compacted = compacted.at[:, dest].set(masked, mode="drop")
    # TODO(synk): torch returns a dynamically-sized (2, num_kept) tensor; TPU
    # requires static shapes, so we return a padded array + count instead.
    return compacted, num_kept


if __name__ == "__main__":
    key = jax.random.PRNGKey(0)
    E = 256
    num_nodes = 32
    edge_index = jax.random.randint(key, (2, E), 0, num_nodes, dtype=jnp.int32)

    compacted, num_kept = drop_edge(edge_index, drop_prob=0.3, seed=42)
    compacted = jax.block_until_ready(compacted)
    num_kept = int(jax.block_until_ready(num_kept))

    # Sanity checks: kept prefix has no padding, tail is all -1 padding,
    # and every kept column exists in the original edge set.
    assert 0 <= num_kept <= E
    prefix = compacted[:, :num_kept]
    tail = compacted[:, num_kept:]
    assert bool(jnp.all(prefix >= 0))
    assert bool(jnp.all(tail == -1))
    matches = jnp.all(prefix[:, :, None] == edge_index[:, None, :], axis=0)
    assert bool(jnp.all(jnp.any(matches, axis=-1)))

    print("KERNEL_OK")
</pallas_src>

<mosaic_0001>
module attributes {stable_mosaic.version = 11 : i64} {
  func.func @_dropedge_kernel(%arg0: i32, %arg1: memref<32x128xi32, #tpu.memory_space<vmem>>, %arg2: memref<2x32x128xi32, #tpu.memory_space<vmem>>, %arg3: memref<2x32x128xi32, #tpu.memory_space<vmem>>, %arg4: memref<32x128xi8, #tpu.memory_space<vmem>>) attributes {dimension_semantics = [#tpu.dimension_semantics<parallel>], iteration_bounds = array<i64: 1>, scalar_prefetch = 0 : i64, scratch_operands = 0 : i64, tpu.core_type = #tpu.core_type<tc>, window_params = [{transform_indices = @transform_0, window_bounds = array<i64: 32, 128>}, {transform_indices = @transform_1, window_bounds = array<i64: 2, 32, 128>}, {transform_indices = @transform_2, window_bounds = array<i64: 2, 32, 128>}, {transform_indices = @transform_3, window_bounds = array<i64: 32, 128>}]} {
    %c0 = arith.constant 0 : index
    %c0_0 = arith.constant 0 : index
    %0 = vector.load %arg1[%c0, %c0_0] : memref<32x128xi32, #tpu.memory_space<vmem>>, vector<32x128xi32>
    %c1288490189_i32 = arith.constant 1288490189 : i32
    %1 = vector.broadcast %c1288490189_i32 : i32 to vector<32x128xi32>
    %2 = arith.cmpi uge, %0, %1 : vector<32x128xi32>
    %3 = arith.extui %2 : vector<32x128xi1> to vector<32x128xi8>
    %c0_1 = arith.constant 0 : index
    %c0_2 = arith.constant 0 : index
    %4 = vector.load %arg4[%c0_1, %c0_2] : memref<32x128xi8, #tpu.memory_space<vmem>>, vector<32x128xi8>
    tpu.vector_store %arg4[%c0_1, %c0_2], %3 {strides = array<i32>} : memref<32x128xi8, #tpu.memory_space<vmem>>, vector<32x128xi8>,
    %5 = vector.shape_cast %2 : vector<32x128xi1> to vector<1x32x128xi1>
    %c0_3 = arith.constant 0 : index
    %c0_4 = arith.constant 0 : index
    %c0_5 = arith.constant 0 : index
    %6 = vector.load %arg2[%c0_3, %c0_4, %c0_5] : memref<2x32x128xi32, #tpu.memory_space<vmem>>, vector<2x32x128xi32>
    %c-1_i32 = arith.constant -1 : i32
    %7 = vector.shape_cast %5 : vector<1x32x128xi1> to vector<1x32x128xi1>
    %8 = vector.broadcast %7 : vector<1x32x128xi1> to vector<2x32x128xi1>
    %9 = vector.broadcast %c-1_i32 : i32 to vector<2x32x128xi32>
    %10 = arith.select %8, %6, %9 : vector<2x32x128xi1>, vector<2x32x128xi32>
    %c0_6 = arith.constant 0 : index
    %c0_7 = arith.constant 0 : index
    %c0_8 = arith.constant 0 : index
    %11 = vector.load %arg3[%c0_6, %c0_7, %c0_8] : memref<2x32x128xi32, #tpu.memory_space<vmem>>, vector<2x32x128xi32>
    tpu.vector_store %arg3[%c0_6, %c0_7, %c0_8], %10 {strides = array<i32>} : memref<2x32x128xi32, #tpu.memory_space<vmem>>, vector<2x32x128xi32>,
    return
  }
  func.func @transform_0(%arg0: i32) -> (i32, i32) {
    %c0_i32 = arith.constant 0 : i32
    %c0_i32_0 = arith.constant 0 : i32
    return %arg0, %c0_i32 : i32, i32
  }
  func.func @transform_1(%arg0: i32) -> (i32, i32, i32) {
    %c0_i32 = arith.constant 0 : i32
    %c0_i32_0 = arith.constant 0 : i32
    %c0_i32_1 = arith.constant 0 : i32
    return %c0_i32, %arg0, %c0_i32_0 : i32, i32, i32
  }
  func.func @transform_2(%arg0: i32) -> (i32, i32, i32) {
    %c0_i32 = arith.constant 0 : i32
    %c0_i32_0 = arith.constant 0 : i32
    %c0_i32_1 = arith.constant 0 : i32
    return %c0_i32, %arg0, %c0_i32_0 : i32, i32, i32
  }
  func.func @transform_3(%arg0: i32) -> (i32, i32) {
    %c0_i32 = arith.constant 0 : i32
    %c0_i32_0 = arith.constant 0 : i32
    return %arg0, %c0_i32 : i32, i32
  }
}

</mosaic_0001>

<bundles_post_ra>
// kernel: tpu_custom_call.1
= control target key start
LH: loop header
LB: loop body
LE: loop exit
PB: predicated region body
PF: predicated region fallthrough
CT: control target
= control target key end

     0   :  { %9 = vsyncpa [#allocation3], 0  ;;  %s344_s0 = inlined_call_operand.hbm [shape: u32[32,128], index: 0, kind: input, shape index: {}]   ;;  %s345_s1 = inlined_call_operand.hbm [shape: s32[2,32,128], index: 1, kind: input, shape index: {}]   ;;  %s346_s2 = inlined_call_operand.hbm [shape: s32[2,32,128], index: 2, kind: output, shape index: {0}]   ;;  %s347_s3 = inlined_call_operand.hbm [shape: s8[32,128], index: 3, kind: output, shape index: {1}]  }
   0x1   :  { %10 = vsyncpa [#allocation6], 0 }
   0x2   :  { %11 = vsyncpa [#allocation4], 0 }
   0x3   :  { %12 = vsyncpa [#allocation9], 0  ;;  %s17_s14 = sshll.u32 %s344_s0, 4  ;;  %s256_s15 = smov [#allocation2]   ;;  %s18_s14 = int_to_ptr.hbm [resolvable:$true] %s17_s14 }
   0x4   :  { %s19_s16 = sshll.u32 %s256_s15, 4  ;;  %s30_s19 = sshll.u32 %s345_s1, 4  ;;  %s20_s16 = int_to_ptr.vmem [resolvable:$true] %s19_s16  ;;  %s31_s19 = int_to_ptr.hbm [resolvable:$true] %s30_s19 }
   0x5   :  { %s257_s20 = smov 128   ;;  %s258_s21 = smov 8  }
   0x6   :  { %25 = dma.hbm_to_vmem [thread:$0]  %s18_s14, 512, %s20_s16, [#allocation3], %s257_s20, %s257_s20, %s258_s21  }
   0x7   :  { %s259_s22 = smov [#allocation5]  }
   0x8   :  { %s32_s23 = sshll.u32 %s259_s22, 4  ;;  %s33_s23 = int_to_ptr.vmem [resolvable:$true] %s32_s23 }
   0x9   :  { %38 = dma.hbm_to_vmem [thread:$0]  %s31_s19, 1024, %s33_s23, [#allocation6], %s257_s20, %s257_s20, %s258_s21  }
   0xa   :  { %248 = dma.done.wait [#allocation3], 512  }
   0xb   :  { %249 = vsyncadd [#allocation3], 4294966784 }
   0xc   :  { %250 = dma.done.wait [#allocation6], 1024  }
   0xd   :  { %251 = vsyncadd [#allocation6], 4294966272  ;;  %v49_v0 = vld [vmem:[#allocation2] sm:$0xff]  ;;  %v50_v1 = vld [vmem:[#allocation2 + $0x8] sm:$0xff]  ;;  %v260_v21 = vmov 0   ;;  %s261_s0 = smov [#allocation8]  }
   0xe   :  { %v51_v2 = vld [vmem:[#allocation2 + $0x10] sm:$0xff]  ;;  %v52_v3 = vld [vmem:[#allocation2 + $0x18] sm:$0xff]  ;;  %v141_v4 = vxor.u32 2147483648, %v49_v0  ;;  %v142_v5 = vxor.u32 2147483648, %v50_v1  ;;  %v73_v7 = vld [vmem:[#allocation5] sm:$0xff]  ;;  %s123_s1 = sshll.u32 %s261_s0, 4  ;;  %s124_s1 = int_to_ptr.vmem [resolvable:$true] %s123_s1 }
   0xf   :  { %v143_v6 = vxor.u32 2147483648, %v51_v2  ;;  %v74_v8 = vld [vmem:[#allocation5 + $0x8] sm:$0xff]  ;;  %v144_v9 = vxor.u32 2147483648, %v52_v3  ;;  %v75_v10 = vld [vmem:[#allocation5 + $0x10] sm:$0xff]  ;;  %v76_v11 = vld [vmem:[#allocation5 + $0x18] sm:$0xff]  ;;  %s125_s26 = sshll.u32 %s347_s3, 4  ;;  %s126_s26 = int_to_ptr.hbm [resolvable:$true] %s125_s26 }
  0x10   :  { %v77_v12 = vld [vmem:[#allocation5 + $0x20] sm:$0xff]  ;;  %vm295_vm0 = vcmp.ge.s32.totalorder %v141_v4, 3435973837  ;;  %vm299_vm1 = vcmp.ge.s32.totalorder %v142_v5, 3435973837  ;;  %v78_v20 = vld [vmem:[#allocation5 + $0x28] sm:$0xff] }
  0x11   :  { %vm303_vm2 = vcmp.ge.s32.totalorder %v143_v6, 3435973837  ;;  %vm307_vm3 = vcmp.ge.s32.totalorder %v144_v9, 3435973837  ;;  %vm65_vm4 = vmpackc.low %vm299_vm1, %vm295_vm0  ;;  %v89_v17 = vsel %vm295_vm0, %v73_v7, 4294967295  ;;  %v90_v18 = vsel %vm299_vm1, %v74_v8, 4294967295 }
  0x12   :  { %v91_v19 = vsel %vm303_vm2, %v75_v10, 4294967295  ;;  %vm66_vm5 = vmpackc.low %vm307_vm3, %vm303_vm2  ;;  %v67_v22 = vsel %vm65_vm4, 16711935, %v260_v21  ;;  %97 = vst [vmem:[#allocation7] sm:$0xff] %v89_v17  ;;  %v92_v23 = vsel %vm307_vm3, %v76_v11, 4294967295  ;;  %v93_v25 = vsel %vm295_vm0, %v77_v12, 4294967295 }
  0x13   :  { %v68_v24 = vsel %vm66_vm5, 16711935, %v260_v21  ;;  %98 = vst [vmem:[#allocation7 + $0x8] sm:$0xff] %v90_v18  ;;  %v79_v26 = vld [vmem:[#allocation5 + $0x30] sm:$0xff]  ;;  %v94_v28 = vsel %vm299_vm1, %v78_v20, 4294967295  ;;  %v80_v29 = vld [vmem:[#allocation5 + $0x38] sm:$0xff] }
  0x14   :  { %v69_v27 = vpack.c.b8 %v68_v24, %v67_v22  ;;  %99 = vst [vmem:[#allocation7 + $0x10] sm:$0xff] %v91_v19  ;;  %s262_s27 = smov [#allocation7]   ;;  %s111_s4 = sshll.u32 %s346_s2, 4  ;;  %v95_v30 = vsel %vm303_vm2, %v79_v26, 4294967295  ;;  %v96_v32 = vsel %vm307_vm3, %v80_v29, 4294967295  ;;  %s112_s4 = int_to_ptr.hbm [resolvable:$true] %s111_s4 }
  0x15   :  { %100 = vst [vmem:[#allocation7 + $0x18] sm:$0xff] %v92_v23  ;;  %s109_s28 = sshll.u32 %s262_s27, 4  ;;  %s110_s28 = int_to_ptr.vmem [resolvable:$true] %s109_s28 }
  0x16   :  { %vm70_vm6 = vnez %v69_v27  ;;  %101 = vst [vmem:[#allocation7 + $0x20] sm:$0xff] %v93_v25 }
  0x17   :  { %v71_v31 = vsel %vm70_vm6, 16843009, %v260_v21  ;;  %102 = vst [vmem:[#allocation7 + $0x28] sm:$0xff] %v94_v28 }
  0x18   :  { %72 = vst [vmem:[#allocation8] sm:$0xff] %v71_v31 }
  0x19   :  { %103 = vst [vmem:[#allocation7 + $0x30] sm:$0xff] %v95_v30  ;;  %128 = dma.vmem_to_hbm [thread:$0]  %s124_s1, 128, %s126_s26, [#allocation9]  }
  0x1a   :  { %104 = vst [vmem:[#allocation7 + $0x38] sm:$0xff] %v96_v32 }
  0x1b   :  { %117 = dma.vmem_to_hbm [thread:$0]  %s110_s28, 1024, %s112_s4, [#allocation4], %s257_s20, %s257_s20, %s258_s21  }
  0x1c   :  { %252 = dma.done.wait [#allocation4], 1024  }
  0x1d   :  { %253 = vsyncadd [#allocation4], 4294966272 }
  0x1e   :  { %254 = dma.done.wait [#allocation9], 128  }
  0x1f   :  { %255 = vsyncadd [#allocation9], 4294967168 }
  0x20   :  { %137 = vsyncpa [#allocation3], 1 }
  0x21   :  { %138 = vsyncpa [#allocation6], 1 }
  0x22   :  { %139 = vsyncpa [#allocation4], 1 }
  0x23   :  { %140 = vsyncpa [#allocation9], 1 }

</bundles_post_ra>
